<compile_context>
chip_gen: v7x
topology: tpu7x:2x2x1
jax: 0.10.0
libtpu: 0.0.40
codegen_flags: <defaults>
</compile_context>

<pallas_src>
import functools
import math

import jax
import jax.numpy as jnp
from jax import lax
from jax.experimental import pallas as pl
from jax.experimental.pallas import tpu as pltpu


def attn_spa_kernel(x_ref, wqkv_ref, pkv_ref, wo_ref, bo_ref, o_ref,
                    *, heads, dim_head):
    """One grid step processes all batch elements in its x block.

    x_ref    : (bb, n, d)       bb = b (collapsed grid) or 1 (grid over batch)
    wqkv_ref : (d, 3*h*dh)      fused, pre-transposed QKV weights (Q pre-scaled)
    pkv_ref  : (2, k, n)        stacked [proj_k.T, proj_v.T]
    wo_ref   : (h*dh, d)        output projection weight, pre-transposed
    bo_ref   : (1, d)           output projection bias (f32)
    o_ref    : (bb, n, d)       output
    """
    hdh = heads * dim_head
    cdt = x_ref.dtype            # MXU operand dtype (bf16 default, or f32)

    wqkv = wqkv_ref[...]         # (d, 3*hdh)   grid-invariant, loaded once
    pk = pkv_ref[0]              # (k, n)
    pv = pkv_ref[1]              # (k, n)
    wo_t = wo_ref[...]           # (hdh, d)
    bo = bo_ref[...]             # (1, d)  f32

    contract_last = (((1,), (1,)), ((), ()))   # contract dim 1 of both operands

    for bi in range(x_ref.shape[0]):           # trace-time loop over batch
        x = x_ref[bi]                          # (n, d)

        # Fused Q/K/V projection — one wide matmul; dh**-0.5 folded into Q
        # weights host-side.
        qkv = jnp.dot(x, wqkv, preferred_element_type=jnp.float32)  # (n, 3*hdh)
        q = qkv[:, :hdh].astype(cdt)
        keys = qkv[:, hdh:2 * hdh].astype(cdt)
        vals = qkv[:, 2 * hdh:].astype(cdt)

        # Linformer sequence-length projection: proj.T @ {keys, vals}.
        keys_p = jnp.dot(pk, keys, preferred_element_type=jnp.float32).astype(cdt)  # (k, hdh)
        vals_p = jnp.dot(pv, vals, preferred_element_type=jnp.float32).astype(cdt)  # (k, hdh)

        # Per-head attention; heads*dh = 32 lanes so the concat stays inside
        # one vreg (masked lane writes) and feeds ONE output-projection matmul.
        head_outs = []
        for hd in range(heads):                # unrolled at trace time
            lo = hd * dim_head
            hi = lo + dim_head
            qh = q[:, lo:hi]                   # (n, dh)
            kh = keys_p[:, lo:hi]              # (k, dh)
            vh = vals_p[:, lo:hi]              # (k, dh)

            dots = lax.dot_general(qh, kh, contract_last,
                                   preferred_element_type=jnp.float32)  # (n, k)
            m = jnp.max(dots, axis=-1, keepdims=True)
            p = jnp.exp(dots - m)
            denom = jnp.sum(p, axis=-1, keepdims=True)
            attn = p * pl.reciprocal(denom, approx=False)   # exact; EUP is idle
            # dropout p=0.0 -> identity

            head_outs.append(jnp.dot(attn.astype(cdt), vh,
                                     preferred_element_type=jnp.float32))  # (n, dh)

        out_cat = jnp.concatenate(head_outs, axis=-1).astype(cdt)  # (n, hdh)
        y = jnp.dot(out_cat, wo_t, preferred_element_type=jnp.float32) + bo
        o_ref[bi] = y.astype(o_ref.dtype)


def _has_multiple_tensorcores():
    """True only where a batch grid buys real parallelism (v7x: 2 TCs/chip)."""
    try:
        kind = (getattr(jax.devices()[0], "device_kind", "") or "").lower()
    except Exception:
        return False
    if "v5" in kind or "v6" in kind:
        return False
    return "v7" in kind


def attn_spa_pallas(x, params, *, heads, dim_head,
                    compute_dtype=jnp.bfloat16, grid_over_batch=None):
    """Linformer attention forward.

    compute_dtype: MXU operand dtype (bf16 default — MXU-native on v5e/v6e/v7x;
                   accumulation and softmax stay f32).  Pass jnp.float32 for
                   tighter parity with the PyTorch reference.
    grid_over_batch: None -> auto (True only on multi-TensorCore parts).
    """
    b, n, d = x.shape
    hdh = heads * dim_head
    kdim = params["proj_k"].shape[1]
    cdt = jnp.dtype(compute_dtype)
    if grid_over_batch is None:
        grid_over_batch = _has_multiple_tensorcores()

    # ---- host-side weight prep (pure layout plumbing, done once) ----
    scale = dim_head ** (-0.5)
    wqkv = jnp.concatenate(
        [params["wq"] * scale, params["wk"], params["wv"]], axis=0).T      # (d, 3*hdh)
    pkv = jnp.stack([params["proj_k"].T, params["proj_v"].T], axis=0)      # (2, k, n)
    wo_t = params["wo"].T                                                  # (hdh, d)
    bo = params["bo"].astype(jnp.float32)                                  # (1, d)

    x_c = x.astype(cdt)
    wqkv = wqkv.astype(cdt)
    pkv = pkv.astype(cdt)
    wo_t = wo_t.astype(cdt)

    kernel = functools.partial(attn_spa_kernel, heads=heads, dim_head=dim_head)

    if grid_over_batch:
        # v7x: one batch element per TensorCore.
        grid = (b,)
        x_spec = pl.BlockSpec((1, n, d), lambda i: (i, 0, 0))
        o_spec = pl.BlockSpec((1, n, d), lambda i: (i, 0, 0))
        semantics = ("parallel",)
    else:
        # v5e/v6e (single TC): one grid step, loop over batch inside the kernel
        # to avoid paying per-step pipeline overhead twice.
        grid = (1,)
        x_spec = pl.BlockSpec((b, n, d), lambda i: (0, 0, 0))
        o_spec = pl.BlockSpec((b, n, d), lambda i: (0, 0, 0))
        semantics = ("arbitrary",)

    return pl.pallas_call(
        kernel,
        out_shape=jax.ShapeDtypeStruct((b, n, d), x.dtype),
        grid_spec=pltpu.PrefetchScalarGridSpec(
            num_scalar_prefetch=0,
            grid=grid,
            in_specs=[
                x_spec,
                pl.BlockSpec((d, 3 * hdh), lambda i: (0, 0)),        # fused W_qkv
                pl.BlockSpec((2, kdim, n), lambda i: (0, 0, 0)),     # [pk.T, pv.T]
                pl.BlockSpec((hdh, d), lambda i: (0, 0)),            # Wo.T
                pl.BlockSpec((1, d), lambda i: (0, 0)),              # bo
            ],
            out_specs=o_spec,
        ),
        compiler_params=pltpu.CompilerParams(dimension_semantics=semantics),
    )(x_c, wqkv, pkv, wo_t, bo)


def attn_spa_reference(x, params, *, heads, dim_head):
    """Pure-JAX reference mirroring the PyTorch forward exactly (f32)."""
    b, n, d = x.shape
    h, dh = heads, dim_head
    kdim = params["proj_k"].shape[1]

    q = x @ params["wq"].T                                     # (b, n, h*dh)
    keys = x @ params["wk"].T                                  # (b, n, h*dh)
    vals = x @ params["wv"].T                                  # (b, n, h*dh)

    keys = jnp.einsum("bnd,nk->bkd", keys, params["proj_k"])   # (b, k, h*dh)
    vals = jnp.einsum("bnd,nk->bkd", vals, params["proj_v"])   # (b, k, h*dh)

    q = q.reshape(b, n, h, dh).transpose(0, 2, 1, 3)           # (b, h, n, dh)
    keys = keys.reshape(b, kdim, h, dh).transpose(0, 2, 1, 3)  # (b, h, k, dh)
    vals = vals.reshape(b, kdim, h, dh).transpose(0, 2, 1, 3)  # (b, h, k, dh)

    dots = jnp.einsum("bhnd,bhkd->bhnk", q, keys) * dh ** (-0.5)
    attn = jax.nn.softmax(dots, axis=-1)
    out = jnp.einsum("bhnk,bhkd->bhnd", attn, vals)
    out = out.transpose(0, 2, 1, 3).reshape(b, n, h * dh)
    return out @ params["wo"].T + params["bo"]


def init_params(key, dim, seq_len, k, heads, dim_head):
    """Deterministic parameter init (mirrors the shapes in Attn_spa.__init__)."""
    hdh = heads * dim_head
    ks = jax.random.split(key, 7)

    def uniform(kk, shape, fan_in):
        std = 1.0 / math.sqrt(fan_in)
        return jax.random.uniform(kk, shape, jnp.float32, -std, std)

    return {
        "wq": uniform(ks[0], (hdh, dim), dim),        # to_q.weight
        "wk": uniform(ks[1], (hdh, dim), dim),        # to_k.weight
        "wv": uniform(ks[2], (hdh, dim), dim),        # to_v.weight
        "proj_k": uniform(ks[3], (seq_len, k), k),    # init_: std = 1/sqrt(k)
        "proj_v": uniform(ks[4], (seq_len, k), k),
        "wo": uniform(ks[5], (dim, hdh), hdh),        # to_out.weight
        "bo": uniform(ks[6], (1, dim), hdh),          # to_out.bias (kept 2D for TPU)
    }


if __name__ == "__main__":
    # Small shapes consistent with the module:
    #   dim=32, heads=4 -> dim_head=8, seq_len=n=8, Linformer k=8, batch=2
    b, n, dim = 2, 8, 32
    heads, kdim = 4, 8
    dim_head = dim // heads

    key = jax.random.PRNGKey(0)
    kx, kp = jax.random.split(key)
    x = jax.random.normal(kx, (b, n, dim), jnp.float32)
    params = init_params(kp, dim, n, kdim, heads, dim_head)

    ref = attn_spa_reference(x, params, heads=heads, dim_head=dim_head)

    # Default path: bf16 MXU operands, f32 accumulate/softmax, auto grid choice.
    out = attn_spa_pallas(x, params, heads=heads, dim_head=dim_head)
    out = jax.block_until_ready(out)
    assert out.shape == (b, n, dim)
    assert jnp.allclose(out, ref, atol=5e-2, rtol=5e-2), "bf16 mismatch vs reference"

    # f32 operands, collapsed-grid path (single-TensorCore layout).
    out_f32 = attn_spa_pallas(x, params, heads=heads, dim_head=dim_head,
                              compute_dtype=jnp.float32, grid_over_batch=False)
    out_f32 = jax.block_until_ready(out_f32)
    assert jnp.allclose(out_f32, ref, atol=5e-3, rtol=5e-3), "f32 mismatch vs reference"

    # bf16, explicit grid-over-batch path (v7x layout) — exercised everywhere
    # for coverage; it is merely a serial 2-step loop on single-TC parts.
    out_grid = attn_spa_pallas(x, params, heads=heads, dim_head=dim_head,
                               grid_over_batch=True)
    out_grid = jax.block_until_ready(out_grid)
    assert jnp.allclose(out_grid, ref, atol=5e-2, rtol=5e-2), "grid-path mismatch"

    print("KERNEL_OK")
</pallas_src>

<mosaic_0001>
module attributes {stable_mosaic.version = 11 : i64} {
  func.func @attn_spa_kernel(%arg0: i32, %arg1: memref<2x8x32xbf16, #tpu.memory_space<vmem>>, %arg2: memref<32x96xbf16, #tpu.memory_space<vmem>>, %arg3: memref<2x8x8xbf16, #tpu.memory_space<vmem>>, %arg4: memref<32x32xbf16, #tpu.memory_space<vmem>>, %arg5: memref<1x32xf32, #tpu.memory_space<vmem>>, %arg6: memref<2x8x32xf32, #tpu.memory_space<vmem>>) attributes {dimension_semantics = [#tpu.dimension_semantics<arbitrary>], iteration_bounds = array<i64: 1>, scalar_prefetch = 0 : i64, scratch_operands = 0 : i64, tpu.core_type = #tpu.core_type<tc>, window_params = [{pipeline_mode = #tpu.pipeline_mode<synchronous>, transform_indices = @transform_0, window_bounds = array<i64: 2, 8, 32>}, {pipeline_mode = #tpu.pipeline_mode<synchronous>, transform_indices = @transform_1, window_bounds = array<i64: 32, 96>}, {pipeline_mode = #tpu.pipeline_mode<synchronous>, transform_indices = @transform_2, window_bounds = array<i64: 2, 8, 8>}, {pipeline_mode = #tpu.pipeline_mode<synchronous>, transform_indices = @transform_3, window_bounds = array<i64: 32, 32>}, {pipeline_mode = #tpu.pipeline_mode<synchronous>, transform_indices = @transform_4, window_bounds = array<i64: 1, 32>}, {pipeline_mode = #tpu.pipeline_mode<synchronous>, transform_indices = @transform_5, window_bounds = array<i64: 2, 8, 32>}]} {
    %c0 = arith.constant 0 : index
    %c0_0 = arith.constant 0 : index
    %0 = vector.load %arg2[%c0, %c0_0] : memref<32x96xbf16, #tpu.memory_space<vmem>>, vector<32x96xbf16>
    %c0_1 = arith.constant 0 : index
    %c0_2 = arith.constant 0 : index
    %c0_3 = arith.constant 0 : index
    %1 = vector.load %arg3[%c0_1, %c0_2, %c0_3] : memref<2x8x8xbf16, #tpu.memory_space<vmem>>, vector<1x8x8xbf16>
    %2 = vector.shape_cast %1 : vector<1x8x8xbf16> to vector<8x8xbf16>
    %c1 = arith.constant 1 : index
    %c0_4 = arith.constant 0 : index
    %c0_5 = arith.constant 0 : index
    %3 = vector.load %arg3[%c1, %c0_4, %c0_5] : memref<2x8x8xbf16, #tpu.memory_space<vmem>>, vector<1x8x8xbf16>
    %4 = vector.shape_cast %3 : vector<1x8x8xbf16> to vector<8x8xbf16>
    %c0_6 = arith.constant 0 : index
    %c0_7 = arith.constant 0 : index
    %5 = vector.load %arg4[%c0_6, %c0_7] : memref<32x32xbf16, #tpu.memory_space<vmem>>, vector<32x32xbf16>
    %c0_8 = arith.constant 0 : index
    %c0_9 = arith.constant 0 : index
    %6 = vector.load %arg5[%c0_8, %c0_9] : memref<1x32xf32, #tpu.memory_space<vmem>>, vector<1x32xf32>
    %c0_10 = arith.constant 0 : index
    %c0_11 = arith.constant 0 : index
    %c0_12 = arith.constant 0 : index
    %7 = vector.load %arg1[%c0_10, %c0_11, %c0_12] : memref<2x8x32xbf16, #tpu.memory_space<vmem>>, vector<1x8x32xbf16>
    %8 = vector.shape_cast %7 : vector<1x8x32xbf16> to vector<8x32xbf16>
    %cst = arith.constant dense<0.000000e+00> : vector<8x96xf32>
    %9 = tpu.matmul %8, %0, %cst {dimension_numbers = #tpu.dot_dimension_numbers<[1], [0], [0], [1], [0, 0, 1, 1], [], []>} : vector<8x32xbf16>, vector<32x96xbf16>, vector<8x96xf32> -> vector<8x96xf32>
    %10 = vector.extract_strided_slice %9 {offsets = [0, 0], sizes = [8, 32], strides = [1, 1]} : vector<8x96xf32> to vector<8x32xf32>
    %11 = arith.truncf %10 : vector<8x32xf32> to vector<8x32xbf16>
    %12 = vector.extract_strided_slice %9 {offsets = [0, 32], sizes = [8, 32], strides = [1, 1]} : vector<8x96xf32> to vector<8x32xf32>
    %13 = arith.truncf %12 : vector<8x32xf32> to vector<8x32xbf16>
    %14 = vector.extract_strided_slice %9 {offsets = [0, 64], sizes = [8, 32], strides = [1, 1]} : vector<8x96xf32> to vector<8x32xf32>
    %15 = arith.truncf %14 : vector<8x32xf32> to vector<8x32xbf16>
    %cst_13 = arith.constant dense<0.000000e+00> : vector<8x32xf32>
    %16 = tpu.matmul %2, %13, %cst_13 {dimension_numbers = #tpu.dot_dimension_numbers<[1], [0], [0], [1], [0, 0, 1, 1], [], []>} : vector<8x8xbf16>, vector<8x32xbf16>, vector<8x32xf32> -> vector<8x32xf32>
    %17 = arith.truncf %16 : vector<8x32xf32> to vector<8x32xbf16>
    %cst_14 = arith.constant dense<0.000000e+00> : vector<8x32xf32>
    %18 = tpu.matmul %4, %15, %cst_14 {dimension_numbers = #tpu.dot_dimension_numbers<[1], [0], [0], [1], [0, 0, 1, 1], [], []>} : vector<8x8xbf16>, vector<8x32xbf16>, vector<8x32xf32> -> vector<8x32xf32>
    %19 = arith.truncf %18 : vector<8x32xf32> to vector<8x32xbf16>
    %20 = vector.extract_strided_slice %11 {offsets = [0, 0], sizes = [8, 8], strides = [1, 1]} : vector<8x32xbf16> to vector<8x8xbf16>
    %21 = vector.extract_strided_slice %17 {offsets = [0, 0], sizes = [8, 8], strides = [1, 1]} : vector<8x32xbf16> to vector<8x8xbf16>
    %22 = vector.extract_strided_slice %19 {offsets = [0, 0], sizes = [8, 8], strides = [1, 1]} : vector<8x32xbf16> to vector<8x8xbf16>
    %cst_15 = arith.constant dense<0.000000e+00> : vector<8x8xf32>
    %23 = tpu.matmul %20, %21, %cst_15 {dimension_numbers = #tpu.dot_dimension_numbers<[1], [1], [0], [0], [0, 0, 1, 0], [], []>} : vector<8x8xbf16>, vector<8x8xbf16>, vector<8x8xf32> -> vector<8x8xf32>
    %cst_16 = arith.constant dense<0xFF800000> : vector<8xf32>
    %24 = vector.multi_reduction <maximumf>, %23, %cst_16 [1] : vector<8x8xf32> to vector<8xf32>
    %25 = vector.shape_cast %24 : vector<8xf32> to vector<8x1xf32>
    %26 = vector.broadcast %25 : vector<8x1xf32> to vector<8x8xf32>
    %27 = arith.subf %23, %26 : vector<8x8xf32>
    %28 = math.exp %27 : vector<8x8xf32>
    %cst_17 = arith.constant dense<0.000000e+00> : vector<8xf32>
    %29 = vector.multi_reduction <add>, %28, %cst_17 [1] : vector<8x8xf32> to vector<8xf32>
    %30 = vector.shape_cast %29 : vector<8xf32> to vector<8x1xf32>
    %31 = tpu.reciprocal %30 : vector<8x1xf32> -> vector<8x1xf32>
    %32 = vector.broadcast %31 : vector<8x1xf32> to vector<8x8xf32>
    %33 = arith.mulf %28, %32 : vector<8x8xf32>
    %34 = arith.truncf %33 : vector<8x8xf32> to vector<8x8xbf16>
    %cst_18 = arith.constant dense<0.000000e+00> : vector<8x8xf32>
    %35 = tpu.matmul %34, %22, %cst_18 {dimension_numbers = #tpu.dot_dimension_numbers<[1], [0], [0], [1], [0, 0, 1, 1], [], []>} : vector<8x8xbf16>, vector<8x8xbf16>, vector<8x8xf32> -> vector<8x8xf32>
    %36 = vector.extract_strided_slice %11 {offsets = [0, 8], sizes = [8, 8], strides = [1, 1]} : vector<8x32xbf16> to vector<8x8xbf16>
    %37 = vector.extract_strided_slice %17 {offsets = [0, 8], sizes = [8, 8], strides = [1, 1]} : vector<8x32xbf16> to vector<8x8xbf16>
    %38 = vector.extract_strided_slice %19 {offsets = [0, 8], sizes = [8, 8], strides = [1, 1]} : vector<8x32xbf16> to vector<8x8xbf16>
    %cst_19 = arith.constant dense<0.000000e+00> : vector<8x8xf32>
    %39 = tpu.matmul %36, %37, %cst_19 {dimension_numbers = #tpu.dot_dimension_numbers<[1], [1], [0], [0], [0, 0, 1, 0], [], []>} : vector<8x8xbf16>, vector<8x8xbf16>, vector<8x8xf32> -> vector<8x8xf32>
    %cst_20 = arith.constant dense<0xFF800000> : vector<8xf32>
    %40 = vector.multi_reduction <maximumf>, %39, %cst_20 [1] : vector<8x8xf32> to vector<8xf32>
    %41 = vector.shape_cast %40 : vector<8xf32> to vector<8x1xf32>
    %42 = vector.broadcast %41 : vector<8x1xf32> to vector<8x8xf32>
    %43 = arith.subf %39, %42 : vector<8x8xf32>
    %44 = math.exp %43 : vector<8x8xf32>
    %cst_21 = arith.constant dense<0.000000e+00> : vector<8xf32>
    %45 = vector.multi_reduction <add>, %44, %cst_21 [1] : vector<8x8xf32> to vector<8xf32>
    %46 = vector.shape_cast %45 : vector<8xf32> to vector<8x1xf32>
    %47 = tpu.reciprocal %46 : vector<8x1xf32> -> vector<8x1xf32>
    %48 = vector.broadcast %47 : vector<8x1xf32> to vector<8x8xf32>
    %49 = arith.mulf %44, %48 : vector<8x8xf32>
    %50 = arith.truncf %49 : vector<8x8xf32> to vector<8x8xbf16>
    %cst_22 = arith.constant dense<0.000000e+00> : vector<8x8xf32>
    %51 = tpu.matmul %50, %38, %cst_22 {dimension_numbers = #tpu.dot_dimension_numbers<[1], [0], [0], [1], [0, 0, 1, 1], [], []>} : vector<8x8xbf16>, vector<8x8xbf16>, vector<8x8xf32> -> vector<8x8xf32>
    %52 = vector.extract_strided_slice %11 {offsets = [0, 16], sizes = [8, 8], strides = [1, 1]} : vector<8x32xbf16> to vector<8x8xbf16>
    %53 = vector.extract_strided_slice %17 {offsets = [0, 16], sizes = [8, 8], strides = [1, 1]} : vector<8x32xbf16> to vector<8x8xbf16>
    %54 = vector.extract_strided_slice %19 {offsets = [0, 16], sizes = [8, 8], strides = [1, 1]} : vector<8x32xbf16> to vector<8x8xbf16>
    %cst_23 = arith.constant dense<0.000000e+00> : vector<8x8xf32>
    %55 = tpu.matmul %52, %53, %cst_23 {dimension_numbers = #tpu.dot_dimension_numbers<[1], [1], [0], [0], [0, 0, 1, 0], [], []>} : vector<8x8xbf16>, vector<8x8xbf16>, vector<8x8xf32> -> vector<8x8xf32>
    %cst_24 = arith.constant dense<0xFF800000> : vector<8xf32>
    %56 = vector.multi_reduction <maximumf>, %55, %cst_24 [1] : vector<8x8xf32> to vector<8xf32>
    %57 = vector.shape_cast %56 : vector<8xf32> to vector<8x1xf32>
    %58 = vector.broadcast %57 : vector<8x1xf32> to vector<8x8xf32>
    %59 = arith.subf %55, %58 : vector<8x8xf32>
    %60 = math.exp %59 : vector<8x8xf32>
    %cst_25 = arith.constant dense<0.000000e+00> : vector<8xf32>
    %61 = vector.multi_reduction <add>, %60, %cst_25 [1] : vector<8x8xf32> to vector<8xf32>
    %62 = vector.shape_cast %61 : vector<8xf32> to vector<8x1xf32>
    %63 = tpu.reciprocal %62 : vector<8x1xf32> -> vector<8x1xf32>
    %64 = vector.broadcast %63 : vector<8x1xf32> to vector<8x8xf32>
    %65 = arith.mulf %60, %64 : vector<8x8xf32>
    %66 = arith.truncf %65 : vector<8x8xf32> to vector<8x8xbf16>
    %cst_26 = arith.constant dense<0.000000e+00> : vector<8x8xf32>
    %67 = tpu.matmul %66, %54, %cst_26 {dimension_numbers = #tpu.dot_dimension_numbers<[1], [0], [0], [1], [0, 0, 1, 1], [], []>} : vector<8x8xbf16>, vector<8x8xbf16>, vector<8x8xf32> -> vector<8x8xf32>
    %68 = vector.extract_strided_slice %11 {offsets = [0, 24], sizes = [8, 8], strides = [1, 1]} : vector<8x32xbf16> to vector<8x8xbf16>
    %69 = vector.extract_strided_slice %17 {offsets = [0, 24], sizes = [8, 8], strides = [1, 1]} : vector<8x32xbf16> to vector<8x8xbf16>
    %70 = vector.extract_strided_slice %19 {offsets = [0, 24], sizes = [8, 8], strides = [1, 1]} : vector<8x32xbf16> to vector<8x8xbf16>
    %cst_27 = arith.constant dense<0.000000e+00> : vector<8x8xf32>
    %71 = tpu.matmul %68, %69, %cst_27 {dimension_numbers = #tpu.dot_dimension_numbers<[1], [1], [0], [0], [0, 0, 1, 0], [], []>} : vector<8x8xbf16>, vector<8x8xbf16>, vector<8x8xf32> -> vector<8x8xf32>
    %cst_28 = arith.constant dense<0xFF800000> : vector<8xf32>
    %72 = vector.multi_reduction <maximumf>, %71, %cst_28 [1] : vector<8x8xf32> to vector<8xf32>
    %73 = vector.shape_cast %72 : vector<8xf32> to vector<8x1xf32>
    %74 = vector.broadcast %73 : vector<8x1xf32> to vector<8x8xf32>
    %75 = arith.subf %71, %74 : vector<8x8xf32>
    %76 = math.exp %75 : vector<8x8xf32>
    %cst_29 = arith.constant dense<0.000000e+00> : vector<8xf32>
    %77 = vector.multi_reduction <add>, %76, %cst_29 [1] : vector<8x8xf32> to vector<8xf32>
    %78 = vector.shape_cast %77 : vector<8xf32> to vector<8x1xf32>
    %79 = tpu.reciprocal %78 : vector<8x1xf32> -> vector<8x1xf32>
    %80 = vector.broadcast %79 : vector<8x1xf32> to vector<8x8xf32>
    %81 = arith.mulf %76, %80 : vector<8x8xf32>
    %82 = arith.truncf %81 : vector<8x8xf32> to vector<8x8xbf16>
    %cst_30 = arith.constant dense<0.000000e+00> : vector<8x8xf32>
    %83 = tpu.matmul %82, %70, %cst_30 {dimension_numbers = #tpu.dot_dimension_numbers<[1], [0], [0], [1], [0, 0, 1, 1], [], []>} : vector<8x8xbf16>, vector<8x8xbf16>, vector<8x8xf32> -> vector<8x8xf32>
    %84 = tpu.concatenate %35, %51, %67, %83 in 1 : vector<8x8xf32>, vector<8x8xf32>, vector<8x8xf32>, vector<8x8xf32> -> vector<8x32xf32>
    %85 = arith.truncf %84 : vector<8x32xf32> to vector<8x32xbf16>
    %cst_31 = arith.constant dense<0.000000e+00> : vector<8x32xf32>
    %86 = tpu.matmul %85, %5, %cst_31 {dimension_numbers = #tpu.dot_dimension_numbers<[1], [0], [0], [1], [0, 0, 1, 1], [], []>} : vector<8x32xbf16>, vector<32x32xbf16>, vector<8x32xf32> -> vector<8x32xf32>
    %87 = vector.broadcast %6 : vector<1x32xf32> to vector<8x32xf32>
    %88 = arith.addf %86, %87 : vector<8x32xf32>
    %c0_32 = arith.constant 0 : index
    %c0_33 = arith.constant 0 : index
    %c0_34 = arith.constant 0 : index
    %89 = vector.load %arg6[%c0_32, %c0_33, %c0_34] : memref<2x8x32xf32, #tpu.memory_space<vmem>>, vector<1x8x32xf32>
    %90 = vector.shape_cast %89 : vector<1x8x32xf32> to vector<8x32xf32>
    %91 = vector.shape_cast %88 : vector<8x32xf32> to vector<1x8x32xf32>
    tpu.vector_store %arg6[%c0_32, %c0_33, %c0_34], %91 {strides = array<i32>} : memref<2x8x32xf32, #tpu.memory_space<vmem>>, vector<1x8x32xf32>,
    %c1_35 = arith.constant 1 : index
    %c0_36 = arith.constant 0 : index
    %c0_37 = arith.constant 0 : index
    %92 = vector.load %arg1[%c1_35, %c0_36, %c0_37] : memref<2x8x32xbf16, #tpu.memory_space<vmem>>, vector<1x8x32xbf16>
    %93 = vector.shape_cast %92 : vector<1x8x32xbf16> to vector<8x32xbf16>
    %cst_38 = arith.constant dense<0.000000e+00> : vector<8x96xf32>
    %94 = tpu.matmul %93, %0, %cst_38 {dimension_numbers = #tpu.dot_dimension_numbers<[1], [0], [0], [1], [0, 0, 1, 1], [], []>} : vector<8x32xbf16>, vector<32x96xbf16>, vector<8x96xf32> -> vector<8x96xf32>
    %95 = vector.extract_strided_slice %94 {offsets = [0, 0], sizes = [8, 32], strides = [1, 1]} : vector<8x96xf32> to vector<8x32xf32>
    %96 = arith.truncf %95 : vector<8x32xf32> to vector<8x32xbf16>
    %97 = vector.extract_strided_slice %94 {offsets = [0, 32], sizes = [8, 32], strides = [1, 1]} : vector<8x96xf32> to vector<8x32xf32>
    %98 = arith.truncf %97 : vector<8x32xf32> to vector<8x32xbf16>
    %99 = vector.extract_strided_slice %94 {offsets = [0, 64], sizes = [8, 32], strides = [1, 1]} : vector<8x96xf32> to vector<8x32xf32>
    %100 = arith.truncf %99 : vector<8x32xf32> to vector<8x32xbf16>
    %cst_39 = arith.constant dense<0.000000e+00> : vector<8x32xf32>
    %101 = tpu.matmul %2, %98, %cst_39 {dimension_numbers = #tpu.dot_dimension_numbers<[1], [0], [0], [1], [0, 0, 1, 1], [], []>} : vector<8x8xbf16>, vector<8x32xbf16>, vector<8x32xf32> -> vector<8x32xf32>
    %102 = arith.truncf %101 : vector<8x32xf32> to vector<8x32xbf16>
    %cst_40 = arith.constant dense<0.000000e+00> : vector<8x32xf32>
    %103 = tpu.matmul %4, %100, %cst_40 {dimension_numbers = #tpu.dot_dimension_numbers<[1], [0], [0], [1], [0, 0, 1, 1], [], []>} : vector<8x8xbf16>, vector<8x32xbf16>, vector<8x32xf32> -> vector<8x32xf32>
    %104 = arith.truncf %103 : vector<8x32xf32> to vector<8x32xbf16>
    %105 = vector.extract_strided_slice %96 {offsets = [0, 0], sizes = [8, 8], strides = [1, 1]} : vector<8x32xbf16> to vector<8x8xbf16>
    %106 = vector.extract_strided_slice %102 {offsets = [0, 0], sizes = [8, 8], strides = [1, 1]} : vector<8x32xbf16> to vector<8x8xbf16>
    %107 = vector.extract_strided_slice %104 {offsets = [0, 0], sizes = [8, 8], strides = [1, 1]} : vector<8x32xbf16> to vector<8x8xbf16>
    %cst_41 = arith.constant dense<0.000000e+00> : vector<8x8xf32>
    %108 = tpu.matmul %105, %106, %cst_41 {dimension_numbers = #tpu.dot_dimension_numbers<[1], [1], [0], [0], [0, 0, 1, 0], [], []>} : vector<8x8xbf16>, vector<8x8xbf16>, vector<8x8xf32> -> vector<8x8xf32>
    %cst_42 = arith.constant dense<0xFF800000> : vector<8xf32>
    %109 = vector.multi_reduction <maximumf>, %108, %cst_42 [1] : vector<8x8xf32> to vector<8xf32>
    %110 = vector.shape_cast %109 : vector<8xf32> to vector<8x1xf32>
    %111 = vector.broadcast %110 : vector<8x1xf32> to vector<8x8xf32>
    %112 = arith.subf %108, %111 : vector<8x8xf32>
    %113 = math.exp %112 : vector<8x8xf32>
    %cst_43 = arith.constant dense<0.000000e+00> : vector<8xf32>
    %114 = vector.multi_reduction <add>, %113, %cst_43 [1] : vector<8x8xf32> to vector<8xf32>
    %115 = vector.shape_cast %114 : vector<8xf32> to vector<8x1xf32>
    %116 = tpu.reciprocal %115 : vector<8x1xf32> -> vector<8x1xf32>
    %117 = vector.broadcast %116 : vector<8x1xf32> to vector<8x8xf32>
    %118 = arith.mulf %113, %117 : vector<8x8xf32>
    %119 = arith.truncf %118 : vector<8x8xf32> to vector<8x8xbf16>
    %cst_44 = arith.constant dense<0.000000e+00> : vector<8x8xf32>
    %120 = tpu.matmul %119, %107, %cst_44 {dimension_numbers = #tpu.dot_dimension_numbers<[1], [0], [0], [1], [0, 0, 1, 1], [], []>} : vector<8x8xbf16>, vector<8x8xbf16>, vector<8x8xf32> -> vector<8x8xf32>
    %121 = vector.extract_strided_slice %96 {offsets = [0, 8], sizes = [8, 8], strides = [1, 1]} : vector<8x32xbf16> to vector<8x8xbf16>
    %122 = vector.extract_strided_slice %102 {offsets = [0, 8], sizes = [8, 8], strides = [1, 1]} : vector<8x32xbf16> to vector<8x8xbf16>
    %123 = vector.extract_strided_slice %104 {offsets = [0, 8], sizes = [8, 8], strides = [1, 1]} : vector<8x32xbf16> to vector<8x8xbf16>
    %cst_45 = arith.constant dense<0.000000e+00> : vector<8x8xf32>
    %124 = tpu.matmul %121, %122, %cst_45 {dimension_numbers = #tpu.dot_dimension_numbers<[1], [1], [0], [0], [0, 0, 1, 0], [], []>} : vector<8x8xbf16>, vector<8x8xbf16>, vector<8x8xf32> -> vector<8x8xf32>
    %cst_46 = arith.constant dense<0xFF800000> : vector<8xf32>
    %125 = vector.multi_reduction <maximumf>, %124, %cst_46 [1] : vector<8x8xf32> to vector<8xf32>
    %126 = vector.shape_cast %125 : vector<8xf32> to vector<8x1xf32>
    %127 = vector.broadcast %126 : vector<8x1xf32> to vector<8x8xf32>
    %128 = arith.subf %124, %127 : vector<8x8xf32>
    %129 = math.exp %128 : vector<8x8xf32>
    %cst_47 = arith.constant dense<0.000000e+00> : vector<8xf32>
    %130 = vector.multi_reduction <add>, %129, %cst_47 [1] : vector<8x8xf32> to vector<8xf32>
    %131 = vector.shape_cast %130 : vector<8xf32> to vector<8x1xf32>
    %132 = tpu.reciprocal %131 : vector<8x1xf32> -> vector<8x1xf32>
    %133 = vector.broadcast %132 : vector<8x1xf32> to vector<8x8xf32>
    %134 = arith.mulf %129, %133 : vector<8x8xf32>
    %135 = arith.truncf %134 : vector<8x8xf32> to vector<8x8xbf16>
    %cst_48 = arith.constant dense<0.000000e+00> : vector<8x8xf32>
    %136 = tpu.matmul %135, %123, %cst_48 {dimension_numbers = #tpu.dot_dimension_numbers<[1], [0], [0], [1], [0, 0, 1, 1], [], []>} : vector<8x8xbf16>, vector<8x8xbf16>, vector<8x8xf32> -> vector<8x8xf32>
    %137 = vector.extract_strided_slice %96 {offsets = [0, 16], sizes = [8, 8], strides = [1, 1]} : vector<8x32xbf16> to vector<8x8xbf16>
    %138 = vector.extract_strided_slice %102 {offsets = [0, 16], sizes = [8, 8], strides = [1, 1]} : vector<8x32xbf16> to vector<8x8xbf16>
    %139 = vector.extract_strided_slice %104 {offsets = [0, 16], sizes = [8, 8], strides = [1, 1]} : vector<8x32xbf16> to vector<8x8xbf16>
    %cst_49 = arith.constant dense<0.000000e+00> : vector<8x8xf32>
    %140 = tpu.matmul %137, %138, %cst_49 {dimension_numbers = #tpu.dot_dimension_numbers<[1], [1], [0], [0], [0, 0, 1, 0], [], []>} : vector<8x8xbf16>, vector<8x8xbf16>, vector<8x8xf32> -> vector<8x8xf32>
    %cst_50 = arith.constant dense<0xFF800000> : vector<8xf32>
    %141 = vector.multi_reduction <maximumf>, %140, %cst_50 [1] : vector<8x8xf32> to vector<8xf32>
    %142 = vector.shape_cast %141 : vector<8xf32> to vector<8x1xf32>
    %143 = vector.broadcast %142 : vector<8x1xf32> to vector<8x8xf32>
    %144 = arith.subf %140, %143 : vector<8x8xf32>
    %145 = math.exp %144 : vector<8x8xf32>
    %cst_51 = arith.constant dense<0.000000e+00> : vector<8xf32>
    %146 = vector.multi_reduction <add>, %145, %cst_51 [1] : vector<8x8xf32> to vector<8xf32>
    %147 = vector.shape_cast %146 : vector<8xf32> to vector<8x1xf32>
    %148 = tpu.reciprocal %147 : vector<8x1xf32> -> vector<8x1xf32>
    %149 = vector.broadcast %148 : vector<8x1xf32> to vector<8x8xf32>
    %150 = arith.mulf %145, %149 : vector<8x8xf32>
    %151 = arith.truncf %150 : vector<8x8xf32> to vector<8x8xbf16>
    %cst_52 = arith.constant dense<0.000000e+00> : vector<8x8xf32>
    %152 = tpu.matmul %151, %139, %cst_52 {dimension_numbers = #tpu.dot_dimension_numbers<[1], [0], [0], [1], [0, 0, 1, 1], [], []>} : vector<8x8xbf16>, vector<8x8xbf16>, vector<8x8xf32> -> vector<8x8xf32>
    %153 = vector.extract_strided_slice %96 {offsets = [0, 24], sizes = [8, 8], strides = [1, 1]} : vector<8x32xbf16> to vector<8x8xbf16>
    %154 = vector.extract_strided_slice %102 {offsets = [0, 24], sizes = [8, 8], strides = [1, 1]} : vector<8x32xbf16> to vector<8x8xbf16>
    %155 = vector.extract_strided_slice %104 {offsets = [0, 24], sizes = [8, 8], strides = [1, 1]} : vector<8x32xbf16> to vector<8x8xbf16>
    %cst_53 = arith.constant dense<0.000000e+00> : vector<8x8xf32>
    %156 = tpu.matmul %153, %154, %cst_53 {dimension_numbers = #tpu.dot_dimension_numbers<[1], [1], [0], [0], [0, 0, 1, 0], [], []>} : vector<8x8xbf16>, vector<8x8xbf16>, vector<8x8xf32> -> vector<8x8xf32>
    %cst_54 = arith.constant dense<0xFF800000> : vector<8xf32>
    %157 = vector.multi_reduction <maximumf>, %156, %cst_54 [1] : vector<8x8xf32> to vector<8xf32>
    %158 = vector.shape_cast %157 : vector<8xf32> to vector<8x1xf32>
    %159 = vector.broadcast %158 : vector<8x1xf32> to vector<8x8xf32>
    %160 = arith.subf %156, %159 : vector<8x8xf32>
    %161 = math.exp %160 : vector<8x8xf32>
    %cst_55 = arith.constant dense<0.000000e+00> : vector<8xf32>
    %162 = vector.multi_reduction <add>, %161, %cst_55 [1] : vector<8x8xf32> to vector<8xf32>
    %163 = vector.shape_cast %162 : vector<8xf32> to vector<8x1xf32>
    %164 = tpu.reciprocal %163 : vector<8x1xf32> -> vector<8x1xf32>
    %165 = vector.broadcast %164 : vector<8x1xf32> to vector<8x8xf32>
    %166 = arith.mulf %161, %165 : vector<8x8xf32>
    %167 = arith.truncf %166 : vector<8x8xf32> to vector<8x8xbf16>
    %cst_56 = arith.constant dense<0.000000e+00> : vector<8x8xf32>
    %168 = tpu.matmul %167, %155, %cst_56 {dimension_numbers = #tpu.dot_dimension_numbers<[1], [0], [0], [1], [0, 0, 1, 1], [], []>} : vector<8x8xbf16>, vector<8x8xbf16>, vector<8x8xf32> -> vector<8x8xf32>
    %169 = tpu.concatenate %120, %136, %152, %168 in 1 : vector<8x8xf32>, vector<8x8xf32>, vector<8x8xf32>, vector<8x8xf32> -> vector<8x32xf32>
    %170 = arith.truncf %169 : vector<8x32xf32> to vector<8x32xbf16>
    %cst_57 = arith.constant dense<0.000000e+00> : vector<8x32xf32>
    %171 = tpu.matmul %170, %5, %cst_57 {dimension_numbers = #tpu.dot_dimension_numbers<[1], [0], [0], [1], [0, 0, 1, 1], [], []>} : vector<8x32xbf16>, vector<32x32xbf16>, vector<8x32xf32> -> vector<8x32xf32>
    %172 = vector.broadcast %6 : vector<1x32xf32> to vector<8x32xf32>
    %173 = arith.addf %171, %172 : vector<8x32xf32>
    %c1_58 = arith.constant 1 : index
    %c0_59 = arith.constant 0 : index
    %c0_60 = arith.constant 0 : index
    %174 = vector.load %arg6[%c1_58, %c0_59, %c0_60] : memref<2x8x32xf32, #tpu.memory_space<vmem>>, vector<1x8x32xf32>
    %175 = vector.shape_cast %174 : vector<1x8x32xf32> to vector<8x32xf32>
    %176 = vector.shape_cast %173 : vector<8x32xf32> to vector<1x8x32xf32>
    tpu.vector_store %arg6[%c1_58, %c0_59, %c0_60], %176 {strides = array<i32>} : memref<2x8x32xf32, #tpu.memory_space<vmem>>, vector<1x8x32xf32>,
    return
  }
  func.func @transform_0(%arg0: i32) -> (i32, i32, i32) {
    %c0_i32 = arith.constant 0 : i32
    %c0_i32_0 = arith.constant 0 : i32
    %c0_i32_1 = arith.constant 0 : i32
    %c0_i32_2 = arith.constant 0 : i32
    return %c0_i32, %c0_i32_0, %c0_i32_1 : i32, i32, i32
  }
  func.func @transform_1(%arg0: i32) -> (i32, i32) {
    %c0_i32 = arith.constant 0 : i32
    %c0_i32_0 = arith.constant 0 : i32
    %c0_i32_1 = arith.constant 0 : i32
    return %c0_i32, %c0_i32_0 : i32, i32
  }
  func.func @transform_2(%arg0: i32) -> (i32, i32, i32) {
    %c0_i32 = arith.constant 0 : i32
    %c0_i32_0 = arith.constant 0 : i32
    %c0_i32_1 = arith.constant 0 : i32
    %c0_i32_2 = arith.constant 0 : i32
    return %c0_i32, %c0_i32_0, %c0_i32_1 : i32, i32, i32
  }
  func.func @transform_3(%arg0: i32) -> (i32, i32) {
    %c0_i32 = arith.constant 0 : i32
    %c0_i32_0 = arith.constant 0 : i32
    %c0_i32_1 = arith.constant 0 : i32
    return %c0_i32, %c0_i32_0 : i32, i32
  }
  func.func @transform_4(%arg0: i32) -> (i32, i32) {
    %c0_i32 = arith.constant 0 : i32
    %c0_i32_0 = arith.constant 0 : i32
    %c0_i32_1 = arith.constant 0 : i32
    return %c0_i32, %c0_i32_0 : i32, i32
  }
  func.func @transform_5(%arg0: i32) -> (i32, i32, i32) {
    %c0_i32 = arith.constant 0 : i32
    %c0_i32_0 = arith.constant 0 : i32
    %c0_i32_1 = arith.constant 0 : i32
    %c0_i32_2 = arith.constant 0 : i32
    return %c0_i32, %c0_i32_0, %c0_i32_1 : i32, i32, i32
  }
}

</mosaic_0001>

<bundles_post_ra>
// kernel: tpu_custom_call.1
= control target key start
LH: loop header
LB: loop body
LE: loop exit
PB: predicated region body
PF: predicated region fallthrough
CT: control target
= control target key end

     0   :  { %10 = vsyncpa [#allocation3], 0  ;;  %s2160_s0 = inlined_call_operand.hbm [shape: bf16[2,8,32], index: 0, kind: input, shape index: {}]   ;;  %s2161_s1 = inlined_call_operand.hbm [shape: bf16[32,96], index: 1, kind: input, shape index: {}]   ;;  %s2162_s2 = inlined_call_operand.hbm [shape: bf16[2,8,8], index: 2, kind: input, shape index: {}]   ;;  %s2163_s3 = inlined_call_operand.hbm [shape: bf16[32,32], index: 3, kind: input, shape index: {}]   ;;  %s2164_s4 = inlined_call_operand.vmem [shape: f32[1,32], index: 4, kind: input, shape index: {}]   ;;  %s2165_s5 = inlined_call_operand.hbm [shape: f32[2,8,32], index: 5, kind: output, shape index: {}]  }
   0x1   :  { %11 = vsyncpa [#allocation6], 0 }
   0x2   :  { %12 = vsyncpa [#allocation9], 0 }
   0x3   :  { %13 = vsyncpa [#allocation4], 0  ;;  %s1823_s18 = smov [#allocation5]   ;;  %s1824_s20 = smov [#allocation2]  }
   0x4   :  { %s31_s19 = sshll.u32 %s1823_s18, 4  ;;  %s19_s21 = sshll.u32 %s1824_s20, 4  ;;  %s32_s19 = int_to_ptr.vmem [resolvable:$true] %s31_s19  ;;  %s1870_s21 = int_to_ptr.vmem [resolvable:$true] %s19_s21 }
   0x5   :  { %s1705_s24 = scalar_lea.hbm %s2161_s1, 256 }
   0x6   :  { %p1706_p0 = scmp.ne.s32.totalorder %s2161_s1, %s1705_s24  ;;  %p1709_p1 = scmp.lt.u32.totalorder %s1705_s24, %s2161_s1 }
   0x8   :  { %p1711_p2 = pnand %p1709_p1, %p1706_p0 }
   0xa   :  { %1714 = shalt.err (!%p1711_p2)
}
   0xb   :  { %s1715_s29 = scalar_lea.vmem %s32_s19, 256  ;;  %p1720_p4 = scmp.lt.s32.totalorder %s32_s19, %s32_s19 }
   0xc   :  { %p1716_p3 = scmp.ne.s32.totalorder %s32_s19, %s1715_s29  ;;  %p1721_p5 = scmp.lt.s32.totalorder %s1715_s29, %s1715_s29 }
   0xe   :  { %p1722_p6 = por %p1721_p5, %p1720_p4 }
  0x10   :  { %p1723_p7 = pnand %p1722_p6, %p1716_p3 }
  0x12   :  { %1726 = shalt.err (!%p1723_p7)
}
  0x13   :  { %s1825_s30 = smov 64   ;;  %s1826_s6 = smov 4  }
  0x14   :  { %37 = dma.hbm_to_vmem [thread:$0]  %s2161_s1, 256, %s32_s19, [#allocation6], %s1825_s30, %s1825_s30, %s1826_s6  }
  0x15   :  { %s1727_s11 = scalar_lea.hbm %s2160_s0, 128 }
  0x16   :  { %p1728_p8 = scmp.ne.s32.totalorder %s2160_s0, %s1727_s11  ;;  %p1731_p9 = scmp.lt.u32.totalorder %s1727_s11, %s2160_s0 }
  0x18   :  { %p1733_p10 = pnand %p1731_p9, %p1728_p8 }
  0x1a   :  { %1736 = shalt.err (!%p1733_p10)
}
  0x1b   :  { %s1737_s16 = scalar_lea.vmem %s1870_s21, 128  ;;  %p1742_p12 = scmp.lt.s32.totalorder %s1870_s21, %s1870_s21 }
  0x1c   :  { %p1738_p11 = scmp.ne.s32.totalorder %s1870_s21, %s1737_s16  ;;  %p1743_p13 = scmp.lt.s32.totalorder %s1737_s16, %s1737_s16 }
  0x1e   :  { %p1744_p0 = por %p1743_p13, %p1742_p12 }
  0x20   :  { %p1745_p1 = pnand %p1744_p0, %p1738_p11 }
  0x22   :  { %1748 = shalt.err (!%p1745_p1)
}
  0x23   :  { %25 = dma.hbm_to_vmem [thread:$0]  %s2160_s0, 128, %s1870_s21, [#allocation3], %s1825_s30, %s1825_s30, %s1826_s6  }
  0x24   :  { %s1827_s18 = smov [#allocation7]   ;;  %s1828_s20 = smov [#allocation8]  }
  0x25   :  { %s43_s19 = sshll.u32 %s1827_s18, 4  ;;  %s55_s22 = sshll.u32 %s1828_s20, 4  ;;  %s44_s19 = int_to_ptr.vmem [resolvable:$true] %s43_s19  ;;  %s1907_s22 = int_to_ptr.vmem [resolvable:$true] %s55_s22 }
  0x26   :  { %s1749_s25 = scalar_lea.hbm %s2162_s2, 128 }
  0x27   :  { %p1750_p2 = scmp.ne.s32.totalorder %s2162_s2, %s1749_s25  ;;  %p1753_p3 = scmp.lt.u32.totalorder %s1749_s25, %s2162_s2 }
  0x29   :  { %p1755_p4 = pnand %p1753_p3, %p1750_p2 }
  0x2b   :  { %1758 = shalt.err (!%p1755_p4)
}
  0x2c   :  { %s1759_s0 = scalar_lea.vmem %s44_s19, 128  ;;  %p1764_p6 = scmp.lt.s32.totalorder %s44_s19, %s44_s19 }
  0x2d   :  { %p1760_p5 = scmp.ne.s32.totalorder %s44_s19, %s1759_s0  ;;  %p1765_p7 = scmp.lt.s32.totalorder %s1759_s0, %s1759_s0 }
  0x2f   :  { %p1766_p8 = por %p1765_p7, %p1764_p6 }
  0x31   :  { %p1767_p9 = pnand %p1766_p8, %p1760_p5 }
  0x33   :  { %1770 = shalt.err (!%p1767_p9)
}
  0x34   :  { %49 = dma.hbm_to_vmem [thread:$0]  %s2162_s2, 128, %s44_s19, [#allocation6], %s1825_s30, %s1825_s30, %s1826_s6  }
  0x35   :  { %s1771_s10 = scalar_lea.hbm %s2163_s3, 256 }
  0x36   :  { %p1772_p10 = scmp.ne.s32.totalorder %s2163_s3, %s1771_s10  ;;  %p1775_p11 = scmp.lt.u32.totalorder %s1771_s10, %s2163_s3 }
  0x38   :  { %p1777_p12 = pnand %p1775_p11, %p1772_p10 }
  0x3a   :  { %1780 = shalt.err (!%p1777_p12)
}
  0x3b   :  { %s1781_s15 = scalar_lea.vmem %s1907_s22, 256  ;;  %p1786_p0 = scmp.lt.s32.totalorder %s1907_s22, %s1907_s22 }
  0x3c   :  { %p1782_p13 = scmp.ne.s32.totalorder %s1907_s22, %s1781_s15  ;;  %p1787_p1 = scmp.lt.s32.totalorder %s1781_s15, %s1781_s15 }
  0x3e   :  { %p1788_p2 = por %p1787_p1, %p1786_p0 }
  0x40   :  { %p1789_p3 = pnand %p1788_p2, %p1782_p13 }
  0x42   :  { %1792 = shalt.err (!%p1789_p3)
}
  0x43   :  { %61 = dma.hbm_to_vmem [thread:$0]  %s2163_s3, 256, %s1907_s22, [#allocation9], %s1825_s30, %s1825_s30, %s1826_s6  }
  0x44   :  { %1815 = dma.done.wait [#allocation3], 128  }
  0x45   :  { %1816 = vsyncadd [#allocation3], 4294967168 }
  0x46   :  { %1817 = dma.done.wait [#allocation6], 384  }
  0x47   :  { %1818 = vsyncadd [#allocation6], 4294966912 }
  0x48   :  { %1819 = dma.done.wait [#allocation9], 256  }
  0x49   :  { %1820 = vsyncadd [#allocation9], 4294967040  ;;  %v1829_v0 = vmov 0.0   ;;  %vm1830_vm0 = vmmov 0   ;;  %v1950_v1 = vld [vmem:[#allocation5] sm:$0xff]   ;;  %v1953_v2 = vld [vmem:[#allocation5 + $0x8] sm:$0xff]  }
  0x4a   :  { %1500 = vmatprep.subr.bf16.mxu0 %v1829_v0  ;;  %1504 = vmatprep.mubr.msk.bf16.mxu0 %vm1830_vm0, %v1829_v0  ;;  %v89_v3 = vld [vmem:[#allocation2] sm:$0xf]  ;;  %vm102_vm1 = vcmask 261120   ;;  %s1831_s3 = smov 120   ;;  %s1832_s6 = smov 96   ;;  %vm154_vm2 = vcmask 1043456  }
  0x4b   :  { %1508 = vmatprep.subr.bf16.mxu1 %v1829_v0  ;;  %1510 = vmatprep.mubr.msk.bf16.mxu1 %vm1830_vm0, %v1829_v0  ;;  %v1964_v11 = vld [vmem:[#allocation7] sm:$0xf]  ;;  %vm150_vm3 = vcmask 64512   ;;  %s1833_s1 = smov 112   ;;  %s1834_s17 = smov 104   ;;  %vm697_vm4 = vcmask 130048  }
  0x4c   :  { %1501 = vmatpush3.bf16.msra.mxu0 %v1950_v1  ;;  %v1987_v26 = vld [vmem:[#allocation7 + $0x4] sm:$0xf]  ;;  %s1835_s18 = smov 8   ;;  %s1836_s19 = smov 16   ;;  %vm699_vm5 = vcmask 195584  }
  0x4d   :  { %1502 = vmatprep.subr.bf16.mxu0 %v1829_v0  ;;  %s1837_s20 = smov 24  }
  0x50   :  { %1503 = vmatpush3.bf16.msra.mxu0 %v1953_v2 }
  0x51   :  { %1520 = vmatprep.subr.bf16.mxu0 %v1829_v0 }
  0x53   :  { %1505 = vmatmul.mubr.msk.bf16.vlgmr.msra.gmra.mrb[0].mxu0 %vm102_vm1, %v89_v3 }
  0x54   :  { %1522 = vmatprep.mubr.msk.bf16.mxu0 %vm1830_vm0, %v1829_v0 }
 0x126   :  { %v140_v4 = vpop.f32.mrb[0].mxu0 }
 0x127   :  { %v146_v5 = vpack.c.bf16 %v140_v4, %v140_v4  ;;  %v1506_v6 = vpop.f32.mrb[1].mxu0 }
 0x128   :  { %v143_v7 = vpop.f32.mrb[2].mxu0 }
 0x129   :  { %352 = vrot.lane.b32.xlu1 %v146_v5, %s1831_s3  ;;  %148 = vrot.lane.b32.xlu0 %v146_v5, %s1832_s6  ;;  %v1507_v8 = vpop.f32.mrb[3].mxu0 }
 0x19b   :  { %v149_v9 = vpop.permute.xlu0 %148  ;;  %v353_v18 = vpop.permute.xlu1 %352 }
 0x19c   :  { %v156_v10 = vsel %vm154_vm2, %v149_v9, 0 }
 0x19d   :  { %1509 = vmatpush3.bf16.msra.mxu1 %v156_v10 }
 0x19e   :  { %1514 = vmatprep.subr.bf16.mxu1 %v1829_v0 }
 0x1a0   :  { %1511 = vmatmul.mubr.msk.bf16.vlgmr.msra.gmra.mrb[0].mxu1 %vm150_vm3, %v1964_v11 }
 0x1a1   :  { %1516 = vmatprep.mubr.msk.bf16.mxu1 %vm1830_vm0, %v1829_v0 }
 0x273   :  { %v192_v12 = vpop.f32.mrb[0].mxu1 }
 0x274   :  { %v198_v13 = vpack.c.bf16 %v192_v12, %v192_v12  ;;  %v1512_v14 = vpop.f32.mrb[1].mxu1 }
 0x275   :  { %v195_v15 = vpop.f32.mrb[2].mxu1 }
 0x276   :  { %466 = vrot.lane.b32.xlu1 %v198_v13, %s1833_s1  ;;  %355 = vrot.lane.b32.xlu0 %v198_v13, %s1831_s3  ;;  %v1513_v16 = vpop.f32.mrb[3].mxu1  ;;  %v252_v17 = vsel %vm150_vm3, %v198_v13, 0 }
 0x277   :  { %1521 = vmatpush3.bf16.xpose.msra.mxu0 %v252_v17 }
 0x278   :  { %1532 = vmatprep.subr.bf16.mxu0 %v1829_v0 }
 0x27a   :  { %576 = vrot.lane.b32.xlu1 %v198_v13, %s1834_s17  ;;  %464 = vrot.lane.b32.xlu0 %v146_v5, %s1833_s1 }
 0x27e   :  { %199 = vrot.lane.b32.xlu1 %v146_v5, %s1825_s30  ;;  %574 = vrot.lane.b32.xlu0 %v146_v5, %s1834_s17 }
 0x27f   :  { %1523 = vmatmul.mubr.msk.bf16.vlgmr.msra.gmra.mrb[4].mxu0 %vm150_vm3, %v146_v5 }
 0x280   :  { %1534 = vmatprep.mubr.msk.bf16.mxu0 %vm1830_vm0, %v1829_v0 }
 0x2e8   :  { %v467_v19 = vpop.permute.xlu1 %466  ;;  %v356_v20 = vpop.permute.xlu0 %355 }
 0x2e9   :  { %v361_v21 = vsel %vm150_vm3, %v356_v20, 0  ;;  %v472_v24 = vsel %vm150_vm3, %v467_v19, 0 }
 0x2ea   :  { %1533 = vmatpush3.bf16.xpose.msra.mxu0 %v361_v21 }
 0x2eb   :  { %1544 = vmatprep.subr.bf16.mxu0 %v1829_v0 }
 0x2ec   :  { %v577_v22 = vpop.permute.xlu1 %576  ;;  %v465_v27 = vpop.permute.xlu0 %464 }
 0x2ed   :  { %v582_v28 = vsel %vm150_vm3, %v577_v22, 0 }
 0x2f0   :  { %v200_v23 = vpop.permute.xlu1 %199  ;;  %v575_v29 = vpop.permute.xlu0 %574 }
 0x2f1   :  { %v205_v25 = vsel %vm154_vm2, %v200_v23, 0  ;;  %1535 = vmatmul.mubr.msk.bf16.vlgmr.msra.gmra.mrb[8].mxu0 %vm150_vm3, %v353_v18 }
 0x2f2   :  { %1515 = vmatpush3.bf16.msra.mxu1 %v205_v25  ;;  %1545 = vmatpush3.bf16.xpose.msra.mxu0 %v472_v24 }
 0x2f3   :  { %1546 = vmatprep.mubr.msk.bf16.mxu0 %vm1830_vm0, %v1829_v0  ;;  %1556 = vmatprep.subr.bf16.mxu0 %v1829_v0 }
 0x2f4   :  { %1526 = vmatprep.subr.bf16.mxu1 %v1829_v0 }
 0x2f5   :  { %1517 = vmatmul.mubr.msk.bf16.vlgmr.msra.gmra.mrb[4].mxu1 %vm150_vm3, %v1987_v26 }
 0x2f6   :  { %1528 = vmatprep.mubr.msk.bf16.mxu1 %vm1830_vm0, %v1829_v0 }
 0x2f9   :  { %1547 = vmatmul.mubr.msk.bf16.vlgmr.msra.gmra.mrb[12].mxu0 %vm150_vm3, %v465_v27 }
 0x2fa   :  { %1557 = vmatpush3.bf16.xpose.msra.mxu0 %v582_v28  ;;  %1558 = vmatprep.mubr.msk.bf16.mxu0 %vm1830_vm0, %v1829_v0 }
 0x2fb   :  { %1568 = vmatprep.subr.bf16.mxu0 %v1829_v0 }
 0x301   :  { %1559 = vmatmul.mubr.msk.bf16.vlgmr.msra.gmra.mrb[16].mxu0 %vm150_vm3, %v575_v29 }
 0x302   :  { %1572 = vmatprep.mubr.msk.bf16.mxu0 %vm1830_vm0, %v1829_v0 }
 0x352   :  { %v288_v30 = vpop.f32.mrb[4].mxu0 }
 0x353   :  { %v1524_v31 = vpop.f32.mrb[5].mxu0  ;;  %v294_v32 = vsel %vm150_vm3, %v288_v30, -inf }
 0x354   :  { %295 = vmax.xlane.f32.xlu0 %v294_v32  ;;  %v291_v33 = vpop.f32.mrb[6].mxu0 }
 0x355   :  { %v1525_v34 = vpop.f32.mrb[7].mxu0 }
 0x3c4   :  { %v397_v35 = vpop.f32.mrb[8].mxu0 }
 0x3c5   :  { %v1536_v36 = vpop.f32.mrb[9].mxu0  ;;  %v403_v37 = vsel %vm150_vm3, %v397_v35, -inf }
 0x3c6   :  { %404 = vmax.xlane.f32.xlu1 %v403_v37  ;;  %v400_v38 = vpop.f32.mrb[10].mxu0 }
 0x3c7   :  { %v1537_v39 = vpop.f32.mrb[11].mxu0 }
 0x3c8   :  { %v241_v40 = vpop.f32.mrb[4].mxu1  ;;  %v765_v39 = vld [vmem:[#allocation2 + $0x4] sm:$0xf] }
 0x3c9   :  { %v247_v41 = vpack.c.bf16 %v241_v40, %v241_v40  ;;  %v1518_v42 = vpop.f32.mrb[5].mxu1 }
 0x3ca   :  { %v244_v43 = vpop.f32.mrb[6].mxu1 }
 0x3cb   :  { %v1519_v44 = vpop.f32.mrb[7].mxu1  ;;  %v310_v45 = vsel %vm154_vm2, %v247_v41, 0 }
 0x3cc   :  { %v508_v46 = vpop.f32.mrb[12].mxu0  ;;  %1527 = vmatpush3.bf16.msra.mxu1 %v310_v45 }
 0x3cd   :  { %v1548_v47 = vpop.f32.mrb[13].mxu0  ;;  %v514_v48 = vsel %vm150_vm3, %v508_v46, -inf  ;;  %1538 = vmatprep.subr.bf16.mxu1 %v1829_v0 }
 0x3ce   :  { %515 = vmax.xlane.f32.xlu0 %v514_v48  ;;  %v511_v49 = vpop.f32.mrb[14].mxu0  ;;  %v2048_v47 = vld [vmem:[#allocation8 + $0x8] sm:$0xff]  }
 0x3cf   :  { %v1549_v50 = vpop.f32.mrb[15].mxu0 }
 0x3d4   :  { %v618_v51 = vpop.f32.mrb[16].mxu0 }
 0x3d5   :  { %v1560_v52 = vpop.f32.mrb[17].mxu0  ;;  %v624_v53 = vsel %vm150_vm3, %v618_v51, -inf }
 0x3d6   :  { %625 = vmax.xlane.f32.xlu0 %v624_v53  ;;  %v621_v54 = vpop.f32.mrb[18].mxu0 }
 0x3d7   :  { %v1561_v55 = vpop.f32.mrb[19].mxu0 }
 0x3e1   :  { %v296_v56 = vpop.xlane.xlu0 %295 }
 0x3e2   :  { %v297_v57 = vsub.f32 %v288_v30, %v296_v56 }
 0x3e4   :  { %v298_v58 = vmul.f32 1.442695, %v297_v57 }
 0x3e6   :  { %1673 = vpow2.f32 %v298_v58 }
 0x3f0   :  { %v1674_v59 = vpop.eup %1673 }
 0x3f1   :  { %v300_v60 = vsel %vm150_vm3, %v1674_v59, 0.0 }
 0x3f2   :  { %301 = vadd.xlane.f32.xlu1 %v300_v60 }
 0x403   :  { %416 = vrot.lane.b32.xlu1 %v247_v41, %s1831_s3 }
 0x453   :  { %v405_v61 = vpop.xlane.xlu1 %404 }
 0x454   :  { %v406_v62 = vsub.f32 %v397_v35, %v405_v61 }
 0x456   :  { %v407_v63 = vmul.f32 1.442695, %v406_v62 }
 0x458   :  { %1675 = vpow2.f32 %v407_v63 }
 0x45b   :  { %v516_v3 = vpop.xlane.xlu0 %515 }
 0x45c   :  { %v517_v4 = vsub.f32 %v508_v46, %v516_v3 }
 0x45e   :  { %v518_v5 = vmul.f32 1.442695, %v517_v4 }
 0x460   :  { %1677 = vpow2.f32 %v518_v5 }
 0x462   :  { %v1676_v6 = vpop.eup %1675 }
 0x463   :  { %v626_v7 = vpop.xlane.xlu0 %625  ;;  %v409_v8 = vsel %vm150_vm3, %v1676_v6, 0.0 }
 0x464   :  { %v627_v9 = vsub.f32 %v618_v51, %v626_v7  ;;  %410 = vadd.xlane.f32.xlu0 %v409_v8 }
 0x466   :  { %v628_v10 = vmul.f32 1.442695, %v627_v9  ;;  %v2073_v9 = vld [vmem:[%s2164_s4] ss:$0 sm:$0xff]  ;;  %s1838_s4 = smov [#allocation10]  }
 0x468   :  { %1679 = vpow2.f32 %v628_v10 }
 0x46a   :  { %v1678_v12 = vpop.eup %1677 }
 0x46b   :  { %v520_v13 = vsel %vm150_vm3, %v1678_v12, 0.0 }
 0x46c   :  { %521 = vadd.xlane.f32.xlu1 %v520_v13 }
 0x472   :  { %v1680_v14 = vpop.eup %1679 }
 0x473   :  { %v630_v15 = vsel %vm150_vm3, %v1680_v14, 0.0 }
 0x474   :  { %631 = vadd.xlane.f32.xlu0 %v630_v15 }
 0x47d   :  { %636 = vrot.lane.b32.xlu1 %v247_v41, %s1834_s17 }
 0x47f   :  { %v302_v16 = vpop.xlane.xlu1 %301 }
 0x480   :  { %1681 = vrcp.f32 %v302_v16 }
 0x483   :  { %v417_v18 = vpop.permute.xlu1 %416 }
 0x484   :  { %v422_v21 = vsel %vm154_vm2, %v417_v18, 0 }
 0x48a   :  { %v1682_v17 = vpop.eup %1681  ;;  %526 = vrot.lane.b32.xlu0 %v247_v41, %s1833_s1 }
 0x48b   :  { %v304_v19 = vmul.f32 %v1682_v17, %v1674_v59 }
 0x48d   :  { %v305_v20 = vpack.c.bf16 %v304_v19, %v304_v19 }
 0x48f   :  { %1529 = vmatmul.mubr.msk.bf16.vlgmr.msra.gmra.mrb[8].mxu1 %vm150_vm3, %v305_v20 }
 0x490   :  { %1539 = vmatpush3.bf16.msra.mxu1 %v422_v21  ;;  %1540 = vmatprep.mubr.msk.bf16.mxu1 %vm1830_vm0, %v1829_v0 }
 0x491   :  { %1550 = vmatprep.subr.bf16.mxu1 %v1829_v0 }
 0x4f1   :  { %v411_v22 = vpop.xlane.xlu0 %410 }
 0x4f2   :  { %1683 = vrcp.f32 %v411_v22 }
 0x4f9   :  { %v522_v23 = vpop.xlane.xlu1 %521 }
 0x4fa   :  { %1685 = vrcp.f32 %v522_v23 }
 0x4fc   :  { %v1684_v24 = vpop.eup %1683 }
 0x4fd   :  { %v413_v25 = vmul.f32 %v1684_v24, %v1676_v6  ;;  %v637_v33 = vpop.permute.xlu1 %636 }
 0x4fe   :  { %v642_v35 = vsel %vm154_vm2, %v637_v33, 0 }
 0x4ff   :  { %v414_v27 = vpack.c.bf16 %v413_v25, %v413_v25 }
 0x501   :  { %1541 = vmatmul.mubr.msk.bf16.vlgmr.msra.gmra.mrb[12].mxu1 %vm150_vm3, %v414_v27  ;;  %v632_v28 = vpop.xlane.xlu0 %631 }
 0x502   :  { %1687 = vrcp.f32 %v632_v28  ;;  %1552 = vmatprep.mubr.msk.bf16.mxu1 %vm1830_vm0, %v1829_v0 }
 0x504   :  { %v1686_v29 = vpop.eup %1685 }
 0x505   :  { %v524_v30 = vmul.f32 %v1686_v29, %v1678_v12  ;;  %v527_v31 = vpop.permute.xlu0 %526 }
 0x506   :  { %v532_v32 = vsel %vm154_vm2, %v527_v31, 0 }
 0x507   :  { %1551 = vmatpush3.bf16.msra.mxu1 %v532_v32  ;;  %v525_v34 = vpack.c.bf16 %v524_v30, %v524_v30 }
 0x508   :  { %1562 = vmatprep.subr.bf16.mxu1 %v1829_v0 }
 0x50a   :  { %1553 = vmatmul.mubr.msk.bf16.vlgmr.msra.gmra.mrb[16].mxu1 %vm150_vm3, %v525_v34 }
 0x50b   :  { %1563 = vmatpush3.bf16.msra.mxu1 %v642_v35  ;;  %1564 = vmatprep.mubr.msk.bf16.mxu1 %vm1830_vm0, %v1829_v0 }
 0x50c   :  { %v1688_v36 = vpop.eup %1687  ;;  %1576 = vmatprep.subr.bf16.mxu1 %v1829_v0 }
 0x50d   :  { %v634_v37 = vmul.f32 %v1688_v36, %v1680_v14 }
 0x50f   :  { %v635_v38 = vpack.c.bf16 %v634_v37, %v634_v37 }
 0x512   :  { %1565 = vmatmul.mubr.msk.bf16.vlgmr.msra.gmra.mrb[20].mxu1 %vm150_vm3, %v635_v38 }
 0x513   :  { %1577 = vmatpush3.bf16.msra.mxu1 %v1950_v1  ;;  %1580 = vmatprep.mubr.msk.bf16.mxu1 %vm1830_vm0, %v1829_v0  ;;  %v2043_v1 = vld [vmem:[#allocation8] sm:$0xff]  }
 0x514   :  { %1578 = vmatprep.subr.bf16.mxu1 %v1829_v0  ;;  %1569 = vmatpush3.bf16.msra.mxu0 %v2043_v1 }
 0x515   :  { %1570 = vmatprep.subr.bf16.mxu0 %v1829_v0 }
 0x517   :  { %1579 = vmatpush3.bf16.msra.mxu1 %v1953_v2 }
 0x518   :  { %1590 = vmatprep.subr.bf16.mxu1 %v1829_v0  ;;  %1571 = vmatpush3.bf16.msra.mxu0 %v2048_v47 }
 0x519   :  { %1584 = vmatprep.subr.bf16.mxu0 %v1829_v0 }
 0x51a   :  { %1581 = vmatmul.mubr.msk.bf16.vlgmr.msra.gmra.mrb[24].mxu1 %vm102_vm1, %v765_v39 }
 0x51b   :  { %1592 = vmatprep.mubr.msk.bf16.mxu1 %vm1830_vm0, %v1829_v0 }
 0x562   :  { %v346_v40 = vpop.f32.mrb[8].mxu1 }
 0x563   :  { %v1530_v41 = vpop.f32.mrb[9].mxu1 }
 0x564   :  { %v349_v42 = vpop.f32.mrb[10].mxu1 }
 0x565   :  { %v1531_v43 = vpop.f32.mrb[11].mxu1 }
 0x5d4   :  { %v458_v44 = vpop.f32.mrb[12].mxu1 }
 0x5d5   :  { %685 = vrot.lane.b32.xlu1 %v458_v44, %s1835_s18  ;;  %v1542_v2 = vpop.f32.mrb[13].mxu1 }
 0x5d6   :  { %v461_v45 = vpop.f32.mrb[14].mxu1 }
 0x5d7   :  { %v1543_v46 = vpop.f32.mrb[15].mxu1 }
 0x5dd   :  { %v568_v48 = vpop.f32.mrb[16].mxu1 }
 0x5de   :  { %689 = vrot.lane.b32.xlu0 %v568_v48, %s1836_s19  ;;  %v1554_v49 = vpop.f32.mrb[17].mxu1 }
 0x5df   :  { %v571_v50 = vpop.f32.mrb[18].mxu1 }
 0x5e0   :  { %v1555_v51 = vpop.f32.mrb[19].mxu1 }
 0x5e5   :  { %v678_v52 = vpop.f32.mrb[20].mxu1 }
 0x5e6   :  { %693 = vrot.lane.b32.xlu1 %v678_v52, %s1837_s20  ;;  %v1566_v53 = vpop.f32.mrb[21].mxu1 }
 0x5e7   :  { %v681_v54 = vpop.f32.mrb[22].mxu1 }
 0x5e8   :  { %v1567_v55 = vpop.f32.mrb[23].mxu1 }
 0x5ed   :  { %v803_v56 = vpop.f32.mrb[24].mxu1 }
 0x5ee   :  { %v809_v57 = vpack.c.bf16 %v803_v56, %v803_v56  ;;  %v1582_v58 = vpop.f32.mrb[25].mxu1 }
 0x5ef   :  { %v806_v59 = vpop.f32.mrb[26].mxu1 }
 0x5f0   :  { %811 = vrot.lane.b32.xlu0 %v809_v57, %s1832_s6  ;;  %v1583_v60 = vpop.f32.mrb[27].mxu1 }
 0x5f4   :  { %1007 = vrot.lane.b32.xlu0 %v809_v57, %s1831_s3 }
 0x5f8   :  { %1119 = vrot.lane.b32.xlu0 %v809_v57, %s1833_s1 }
 0x5fc   :  { %1229 = vrot.lane.b32.xlu0 %v809_v57, %s1834_s17 }
 0x647   :  { %v686_v61 = vpop.permute.xlu1 %685 }
 0x648   :  { %v696_v63 = vsel %vm150_vm3, %v346_v40, %v686_v61 }
 0x650   :  { %v690_v62 = vpop.permute.xlu0 %689 }
 0x651   :  { %v698_v3 = vsel %vm697_vm4, %v696_v63, %v690_v62 }
 0x658   :  { %v694_v4 = vpop.permute.xlu1 %693 }
 0x659   :  { %v700_v5 = vsel %vm699_vm5, %v698_v3, %v694_v4 }
 0x65a   :  { %v701_v6 = vpack.c.bf16 %v700_v5, %v700_v5 }
 0x65c   :  { %1573 = vmatmul.mubr.msk.bf16.vlgmr.msra.gmra.mrb[20].mxu0 %vm102_vm1, %v701_v6 }
 0x65d   :  { %1586 = vmatprep.mubr.msk.bf16.mxu0 %vm1830_vm0, %v1829_v0 }
 0x662   :  { %v812_v7 = vpop.permute.xlu0 %811 }
 0x663   :  { %v814_v8 = vsel %vm154_vm2, %v812_v7, 0 }
 0x664   :  { %1585 = vmatpush3.bf16.msra.mxu0 %v814_v8 }
 0x665   :  { %1596 = vmatprep.subr.bf16.mxu0 %v1829_v0 }
 0x666   :  { %v1008_v24 = vpop.permute.xlu0 %1007 }
 0x667   :  { %1587 = vmatmul.mubr.msk.bf16.vlgmr.msra.gmra.mrb[24].mxu0 %vm150_vm3, %v1964_v11 }
 0x668   :  { %1598 = vmatprep.mubr.msk.bf16.mxu0 %vm1830_vm0, %v1829_v0 }
 0x66a   :  { %v1120_v30 = vpop.permute.xlu0 %1119 }
 0x66e   :  { %v1230_v32 = vpop.permute.xlu0 %1229 }
 0x72f   :  { %v757_v10 = vpop.f32.mrb[20].mxu0 }
 0x730   :  { %v758_v12 = vadd.f32 %v2073_v9, %v757_v10  ;;  %v1574_v13 = vpop.f32.mrb[21].mxu0 }
 0x731   :  { %v760_v14 = vpop.f32.mrb[22].mxu0 }
 0x732   :  { %763 = vst.msk [vmem:[#allocation10] sm:$0xff] %vm102_vm1, %v758_v12  ;;  %v1575_v15 = vpop.f32.mrb[23].mxu0 }
 0x73a   :  { %v850_v16 = vpop.f32.mrb[24].mxu0 }
 0x73b   :  { %v856_v17 = vpack.c.bf16 %v850_v16, %v850_v16  ;;  %v1588_v18 = vpop.f32.mrb[25].mxu0 }
 0x73c   :  { %v853_v11 = vpop.f32.mrb[26].mxu0 }
 0x73d   :  { %1010 = vrot.lane.b32.xlu1 %v856_v17, %s1831_s3  ;;  %v1589_v19 = vpop.f32.mrb[27].mxu0  ;;  %v907_v20 = vsel %vm150_vm3, %v856_v17, 0 }
 0x73e   :  { %1597 = vmatpush3.bf16.xpose.msra.mxu0 %v907_v20 }
 0x73f   :  { %1608 = vmatprep.subr.bf16.mxu0 %v1829_v0 }
 0x741   :  { %1121 = vrot.lane.b32.xlu1 %v856_v17, %s1833_s1 }
 0x745   :  { %1231 = vrot.lane.b32.xlu1 %v856_v17, %s1834_s17  ;;  %1599 = vmatmul.mubr.msk.bf16.vlgmr.msra.gmra.mrb[28].mxu0 %vm150_vm3, %v809_v57 }
 0x746   :  { %1610 = vmatprep.mubr.msk.bf16.mxu0 %vm1830_vm0, %v1829_v0 }
 0x749   :  { %857 = vrot.lane.b32.xlu1 %v809_v57, %s1825_s30  ;;  %s1405_s30 = sshll.u32 %s1838_s4, 4  ;;  %s1406_s30 = int_to_ptr.vmem [resolvable:$true] %s1405_s30 }
 0x74a   :  { %s1793_s24 = scalar_lea.vmem %s1406_s30, 256  ;;  %p1798_p5 = scmp.lt.s32.totalorder %s1406_s30, %s1406_s30 }
 0x74b   :  { %p1794_p4 = scmp.ne.s32.totalorder %s1406_s30, %s1793_s24  ;;  %p1799_p6 = scmp.lt.s32.totalorder %s1793_s24, %s1793_s24 }
 0x74d   :  { %p1800_p7 = por %p1799_p6, %p1798_p5 }
 0x74f   :  { %p1801_p8 = pnand %p1800_p7, %p1794_p4 }
 0x7af   :  { %v1011_v21 = vpop.permute.xlu1 %1010 }
 0x7b0   :  { %v1016_v22 = vsel %vm150_vm3, %v1011_v21, 0 }
 0x7b1   :  { %1609 = vmatpush3.bf16.xpose.msra.mxu0 %v1016_v22 }
 0x7b2   :  { %1620 = vmatprep.subr.bf16.mxu0 %v1829_v0 }
 0x7b3   :  { %v1122_v23 = vpop.permute.xlu1 %1121 }
 0x7b4   :  { %v1127_v27 = vsel %vm150_vm3, %v1122_v23, 0 }
 0x7b7   :  { %v1232_v25 = vpop.permute.xlu1 %1231 }
 0x7b8   :  { %1611 = vmatmul.mubr.msk.bf16.vlgmr.msra.gmra.mrb[32].mxu0 %vm150_vm3, %v1008_v24  ;;  %v1237_v31 = vsel %vm150_vm3, %v1232_v25, 0 }
 0x7b9   :  { %1621 = vmatpush3.bf16.xpose.msra.mxu0 %v1127_v27  ;;  %1622 = vmatprep.mubr.msk.bf16.mxu0 %vm1830_vm0, %v1829_v0 }
 0x7ba   :  { %1632 = vmatprep.subr.bf16.mxu0 %v1829_v0 }
 0x7bb   :  { %v858_v28 = vpop.permute.xlu1 %857 }
 0x7bc   :  { %v860_v29 = vsel %vm154_vm2, %v858_v28, 0 }
 0x7bd   :  { %1591 = vmatpush3.bf16.msra.mxu1 %v860_v29 }
 0x7be   :  { %1602 = vmatprep.subr.bf16.mxu1 %v1829_v0 }
 0x7c0   :  { %1623 = vmatmul.mubr.msk.bf16.vlgmr.msra.gmra.mrb[36].mxu0 %vm150_vm3, %v1120_v30  ;;  %1593 = vmatmul.mubr.msk.bf16.vlgmr.msra.gmra.mrb[28].mxu1 %vm150_vm3, %v1987_v26 }
 0x7c1   :  { %1633 = vmatpush3.bf16.xpose.msra.mxu0 %v1237_v31  ;;  %1634 = vmatprep.mubr.msk.bf16.mxu0 %vm1830_vm0, %v1829_v0 }
 0x7c2   :  { %1604 = vmatprep.mubr.msk.bf16.mxu1 %vm1830_vm0, %v1829_v0  ;;  %1644 = vmatprep.subr.bf16.mxu0 %v1829_v0 }
 0x7c8   :  { %1635 = vmatmul.mubr.msk.bf16.vlgmr.msra.gmra.mrb[40].mxu0 %vm150_vm3, %v1230_v32 }
 0x7c9   :  { %1645 = vmatpush3.bf16.msra.mxu0 %v2043_v1  ;;  %1648 = vmatprep.mubr.msk.bf16.mxu0 %vm1830_vm0, %v1829_v0 }
 0x7ca   :  { %1646 = vmatprep.subr.bf16.mxu0 %v1829_v0 }
 0x7cd   :  { %1647 = vmatpush3.bf16.msra.mxu0 %v2048_v47 }
 0x818   :  { %v943_v26 = vpop.f32.mrb[28].mxu0 }
 0x819   :  { %v1600_v33 = vpop.f32.mrb[29].mxu0  ;;  %v949_v34 = vsel %vm150_vm3, %v943_v26, -inf }
 0x81a   :  { %950 = vmax.xlane.f32.xlu0 %v949_v34  ;;  %v946_v35 = vpop.f32.mrb[30].mxu0 }
 0x81b   :  { %v1601_v36 = vpop.f32.mrb[31].mxu0 }
 0x88b   :  { %v1052_v37 = vpop.f32.mrb[32].mxu0 }
 0x88c   :  { %v1612_v38 = vpop.f32.mrb[33].mxu0  ;;  %v1058_v39 = vsel %vm150_vm3, %v1052_v37, -inf }
 0x88d   :  { %1059 = vmax.xlane.f32.xlu1 %v1058_v39  ;;  %v1055_v40 = vpop.f32.mrb[34].mxu0 }
 0x88e   :  { %v1613_v41 = vpop.f32.mrb[35].mxu0 }
 0x893   :  { %v1163_v42 = vpop.f32.mrb[36].mxu0  ;;  %v896_v43 = vpop.f32.mrb[28].mxu1 }
 0x894   :  { %v1624_v1 = vpop.f32.mrb[37].mxu0  ;;  %v1169_v44 = vsel %vm150_vm3, %v1163_v42, -inf  ;;  %v902_v2 = vpack.c.bf16 %v896_v43, %v896_v43  ;;  %v1594_v45 = vpop.f32.mrb[29].mxu1 }
 0x895   :  { %1170 = vmax.xlane.f32.xlu0 %v1169_v44  ;;  %v1166_v46 = vpop.f32.mrb[38].mxu0  ;;  %v899_v47 = vpop.f32.mrb[30].mxu1 }
 0x896   :  { %v1625_v48 = vpop.f32.mrb[39].mxu0  ;;  %v1595_v49 = vpop.f32.mrb[31].mxu1  ;;  %v965_v50 = vsel %vm154_vm2, %v902_v2, 0 }
 0x897   :  { %1603 = vmatpush3.bf16.msra.mxu1 %v965_v50 }
 0x898   :  { %1614 = vmatprep.subr.bf16.mxu1 %v1829_v0 }
 0x89b   :  { %v1273_v51 = vpop.f32.mrb[40].mxu0 }
 0x89c   :  { %v1636_v52 = vpop.f32.mrb[41].mxu0  ;;  %v1279_v53 = vsel %vm150_vm3, %v1273_v51, -inf }
 0x89d   :  { %1280 = vmax.xlane.f32.xlu0 %v1279_v53  ;;  %v1276_v54 = vpop.f32.mrb[42].mxu0 }
 0x89e   :  { %v1637_v55 = vpop.f32.mrb[43].mxu0 }
 0x8a7   :  { %v951_v56 = vpop.xlane.xlu0 %950 }
 0x8a8   :  { %v952_v57 = vsub.f32 %v943_v26, %v951_v56 }
 0x8aa   :  { %v953_v58 = vmul.f32 1.442695, %v952_v57 }
 0x8ac   :  { %1689 = vpow2.f32 %v953_v58 }
 0x8b6   :  { %v1690_v59 = vpop.eup %1689 }
 0x8b7   :  { %v955_v60 = vsel %vm150_vm3, %v1690_v59, 0.0 }
 0x8b8   :  { %956 = vadd.xlane.f32.xlu1 %v955_v60 }
 0x8c9   :  { %1071 = vrot.lane.b32.xlu1 %v902_v2, %s1831_s3 }
 0x91a   :  { %v1060_v61 = vpop.xlane.xlu1 %1059 }
 0x91b   :  { %v1061_v62 = vsub.f32 %v1052_v37, %v1060_v61 }
 0x91d   :  { %v1062_v63 = vmul.f32 1.442695, %v1061_v62 }
 0x91f   :  { %1691 = vpow2.f32 %v1062_v63 }
 0x922   :  { %v1171_v3 = vpop.xlane.xlu0 %1170 }
 0x923   :  { %v1172_v4 = vsub.f32 %v1163_v42, %v1171_v3 }
 0x925   :  { %v1173_v5 = vmul.f32 1.442695, %v1172_v4 }
 0x927   :  { %1693 = vpow2.f32 %v1173_v5 }
 0x929   :  { %v1692_v6 = vpop.eup %1691 }
 0x92a   :  { %v1281_v7 = vpop.xlane.xlu0 %1280  ;;  %v1064_v8 = vsel %vm150_vm3, %v1692_v6, 0.0 }
 0x92b   :  { %v1282_v10 = vsub.f32 %v1273_v51, %v1281_v7  ;;  %1065 = vadd.xlane.f32.xlu0 %v1064_v8 }
 0x92d   :  { %v1283_v12 = vmul.f32 1.442695, %v1282_v10 }
 0x92f   :  { %1695 = vpow2.f32 %v1283_v12 }
 0x931   :  { %v1694_v13 = vpop.eup %1693 }
 0x932   :  { %v1175_v14 = vsel %vm150_vm3, %v1694_v13, 0.0 }
 0x933   :  { %1176 = vadd.xlane.f32.xlu1 %v1175_v14 }
 0x939   :  { %v1696_v15 = vpop.eup %1695 }
 0x93a   :  { %v1285_v16 = vsel %vm150_vm3, %v1696_v15, 0.0 }
 0x93b   :  { %1286 = vadd.xlane.f32.xlu0 %v1285_v16 }
 0x944   :  { %1291 = vrot.lane.b32.xlu1 %v902_v2, %s1834_s17 }
 0x945   :  { %v957_v17 = vpop.xlane.xlu1 %956 }
 0x946   :  { %1697 = vrcp.f32 %v957_v17 }
 0x949   :  { %v1072_v11 = vpop.permute.xlu1 %1071 }
 0x94a   :  { %v1077_v21 = vsel %vm154_vm2, %v1072_v11, 0 }
 0x950   :  { %v1698_v18 = vpop.eup %1697 }
 0x951   :  { %v959_v19 = vmul.f32 %v1698_v18, %v1690_v59  ;;  %1181 = vrot.lane.b32.xlu0 %v902_v2, %s1833_s1 }
 0x953   :  { %v960_v20 = vpack.c.bf16 %v959_v19, %v959_v19 }
 0x955   :  { %1605 = vmatmul.mubr.msk.bf16.vlgmr.msra.gmra.mrb[32].mxu1 %vm150_vm3, %v960_v20 }
 0x956   :  { %1615 = vmatpush3.bf16.msra.mxu1 %v1077_v21  ;;  %1616 = vmatprep.mubr.msk.bf16.mxu1 %vm1830_vm0, %v1829_v0 }
 0x957   :  { %1626 = vmatprep.subr.bf16.mxu1 %v1829_v0 }
 0x9b8   :  { %v1066_v22 = vpop.xlane.xlu0 %1065 }
 0x9b9   :  { %1699 = vrcp.f32 %v1066_v22 }
 0x9c0   :  { %v1177_v23 = vpop.xlane.xlu1 %1176 }
 0x9c1   :  { %1701 = vrcp.f32 %v1177_v23 }
 0x9c3   :  { %v1700_v24 = vpop.eup %1699 }
 0x9c4   :  { %v1068_v25 = vmul.f32 %v1700_v24, %v1692_v6  ;;  %v1292_v26 = vpop.permute.xlu1 %1291 }
 0x9c5   :  { %v1297_v34 = vsel %vm154_vm2, %v1292_v26, 0 }
 0x9c6   :  { %v1069_v27 = vpack.c.bf16 %v1068_v25, %v1068_v25 }
 0x9c8   :  { %1617 = vmatmul.mubr.msk.bf16.vlgmr.msra.gmra.mrb[36].mxu1 %vm150_vm3, %v1069_v27  ;;  %v1287_v28 = vpop.xlane.xlu0 %1286 }
 0x9c9   :  { %1703 = vrcp.f32 %v1287_v28  ;;  %1628 = vmatprep.mubr.msk.bf16.mxu1 %vm1830_vm0, %v1829_v0 }
 0x9cb   :  { %v1702_v29 = vpop.eup %1701 }
 0x9cc   :  { %v1179_v30 = vmul.f32 %v1702_v29, %v1694_v13  ;;  %v1182_v31 = vpop.permute.xlu0 %1181 }
 0x9cd   :  { %v1187_v32 = vsel %vm154_vm2, %v1182_v31, 0 }
 0x9ce   :  { %1627 = vmatpush3.bf16.msra.mxu1 %v1187_v32  ;;  %v1180_v33 = vpack.c.bf16 %v1179_v30, %v1179_v30 }
 0x9cf   :  { %1638 = vmatprep.subr.bf16.mxu1 %v1829_v0 }
 0x9d1   :  { %1629 = vmatmul.mubr.msk.bf16.vlgmr.msra.gmra.mrb[40].mxu1 %vm150_vm3, %v1180_v33 }
 0x9d2   :  { %1639 = vmatpush3.bf16.msra.mxu1 %v1297_v34  ;;  %1640 = vmatprep.mubr.msk.bf16.mxu1 %vm1830_vm0, %v1829_v0 }
 0x9d3   :  { %v1704_v35 = vpop.eup %1703 }
 0x9d4   :  { %v1289_v36 = vmul.f32 %v1704_v35, %v1696_v15 }
 0x9d6   :  { %v1290_v37 = vpack.c.bf16 %v1289_v36, %v1289_v36 }
 0x9d9   :  { %1641 = vmatmul.mubr.msk.bf16.vlgmr.msra.gmra.mrb[44].mxu1 %vm150_vm3, %v1290_v37 }
 0xa28   :  { %v1001_v38 = vpop.f32.mrb[32].mxu1 }
 0xa29   :  { %v1606_v39 = vpop.f32.mrb[33].mxu1 }
 0xa2a   :  { %v1004_v40 = vpop.f32.mrb[34].mxu1 }
 0xa2b   :  { %v1607_v41 = vpop.f32.mrb[35].mxu1 }
 0xa9b   :  { %v1113_v42 = vpop.f32.mrb[36].mxu1 }
 0xa9c   :  { %1340 = vrot.lane.b32.xlu1 %v1113_v42, %s1835_s18  ;;  %v1618_v43 = vpop.f32.mrb[37].mxu1 }
 0xa9d   :  { %v1116_v1 = vpop.f32.mrb[38].mxu1 }
 0xa9e   :  { %v1619_v44 = vpop.f32.mrb[39].mxu1 }
 0xaa4   :  { %v1223_v2 = vpop.f32.mrb[40].mxu1 }
 0xaa5   :  { %1344 = vrot.lane.b32.xlu0 %v1223_v2, %s1836_s19  ;;  %v1630_v45 = vpop.f32.mrb[41].mxu1 }
 0xaa6   :  { %v1226_v0 = vpop.f32.mrb[42].mxu1 }
 0xaa7   :  { %v1631_v46 = vpop.f32.mrb[43].mxu1 }
 0xaac   :  { %v1333_v47 = vpop.f32.mrb[44].mxu1 }
 0xaad   :  { %1348 = vrot.lane.b32.xlu1 %v1333_v47, %s1837_s20  ;;  %v1642_v48 = vpop.f32.mrb[45].mxu1 }
 0xaae   :  { %v1336_v49 = vpop.f32.mrb[46].mxu1 }
 0xaaf   :  { %v1643_v50 = vpop.f32.mrb[47].mxu1 }
 0xb0e   :  { %v1341_v51 = vpop.permute.xlu1 %1340 }
 0xb0f   :  { %v1351_v53 = vsel %vm150_vm3, %v1001_v38, %v1341_v51 }
 0xb17   :  { %v1345_v52 = vpop.permute.xlu0 %1344 }
 0xb18   :  { %v1352_v54 = vsel %vm697_vm4, %v1351_v53, %v1345_v52 }
 0xb1f   :  { %v1349_v55 = vpop.permute.xlu1 %1348 }
 0xb20   :  { %v1353_v56 = vsel %vm699_vm5, %v1352_v54, %v1349_v55 }
 0xb21   :  { %v1354_v57 = vpack.c.bf16 %v1353_v56, %v1353_v56 }
 0xb23   :  { %1649 = vmatmul.mubr.msk.bf16.vlgmr.msra.gmra.mrb[44].mxu0 %vm102_vm1, %v1354_v57 }
 0xbf6   :  { %v1392_v58 = vpop.f32.mrb[44].mxu0 }
 0xbf7   :  { %v1393_v59 = vadd.f32 %v2073_v9, %v1392_v58  ;;  %v1650_v60 = vpop.f32.mrb[45].mxu0 }
 0xbf8   :  { %v1395_v61 = vpop.f32.mrb[46].mxu0 }
 0xbf9   :  { %1399 = vst.msk [vmem:[#allocation10 + $0x8] sm:$0xff] %vm102_vm1, %v1393_v59  ;;  %v1651_v62 = vpop.f32.mrb[47].mxu0 }
 0xbfa   :  { %1804 = shalt.err (!%p1801_p8)
}
 0xbfb   :  { %s1805_s27 = scalar_lea.hbm %s2165_s5, 256 }
 0xbfc   :  { %p1806_p9 = scmp.ne.s32.totalorder %s2165_s5, %s1805_s27  ;;  %p1809_p10 = scmp.lt.u32.totalorder %s1805_s27, %s2165_s5 }
 0xbfe   :  { %p1811_p11 = pnand %p1809_p10, %p1806_p9 }
 0xc00   :  { %1814 = shalt.err (!%p1811_p11)
}
 0xc01   :  { %s1839_s7 = smov 128  }
 0xc02   :  { %1411 = dma.vmem_to_hbm [thread:$0]  %s1406_s30, 256, %s2165_s5, [#allocation4], %s1839_s7, %s1839_s7, %s1835_s18  }
 0xc03   :  { %1821 = dma.done.wait [#allocation4], 256  }
 0xc04   :  { %1822 = vsyncadd [#allocation4], 4294967040 }
 0xc05   :  { %1415 = vsyncpa [#allocation3], 1 }
 0xc06   :  { %1416 = vsyncpa [#allocation6], 1 }
 0xc07   :  { %1417 = vsyncpa [#allocation9], 1 }
 0xc08   :  { %1418 = vsyncpa [#allocation4], 1 }

</bundles_post_ra>
